<compile_context>
chip_gen: v7x
topology: tpu7x:2x2x1
jax: 0.10.0
libtpu: 0.0.40
codegen_flags: <defaults>
</compile_context>

<pallas_src>
import jax
import jax.numpy as jnp
from jax.experimental import pallas as pl
from jax.experimental.pallas import tpu as pltpu


# ----------------------------- Pallas kernels --------------------------------
def _conv_pool_kernel(x_ref, w_ref, b_ref, out_ref):
    # x_ref block: (1, TP, 128) bf16 im2col rows; w_ref: (128, 128) bf16 fused conv weight.
    feat = jnp.dot(x_ref[0], w_ref[...], preferred_element_type=jnp.float32)  # (TP, 128)
    feat = jnp.maximum(feat + b_ref[...], 0.0)                                # bias + ReLU
    out_ref[0] = jnp.sum(feat, axis=0, keepdims=True)                         # partial pool


def _head_kernel(pooled_ref, w_ref, b_ref, out_ref):
    # pooled_ref: (B, 128) f32; w_ref: (128, 128) f32 (pool scale folded in).
    out_ref[...] = (jnp.dot(pooled_ref[...], w_ref[...],
                            preferred_element_type=jnp.float32) + b_ref[...])


# ------------------------------ JAX wrapper ----------------------------------
def adv_model_forward(x_nchw, labels, w_conv, b_conv, w_head, b_head,
                      *, pixel_tile=128, lane_pad=128):
    """AdvModel.forward with NoOpAttacker: images = x; return base_model(images)."""
    del labels  # only the (unimplemented) attacker branch consumes labels/criterion
    B, C, H, W = x_nchw.shape
    hidden = w_conv.shape[0]
    K = w_conv.shape[-1]
    classes = w_head.shape[1]
    pad = K // 2
    kkc = K * K * C
    assert kkc <= lane_pad, "fused conv contraction must fit in 128 lanes"
    assert hidden <= lane_pad and classes <= lane_pad, "hidden/classes must be <= 128"

    total = H * W
    tp = pixel_tile if total % pixel_tile == 0 else total
    n_tiles = total // tp
    bt = B * n_tiles

    # --- lane-dense im2col slab: (B*n_tiles, TP, 128) bf16 ----------------------
    # TODO(synk): for large images the K*K im2col duplication should be replaced by a
    # K-row-shifted layout with in-kernel tap gather to cut HBM traffic; for the small
    # images here the dense-lane / single-matmul layout dominates.
    x_nhwc = jnp.transpose(x_nchw, (0, 2, 3, 1))
    xp = jnp.pad(x_nhwc, ((0, 0), (pad, pad), (pad, pad), (0, 0)))
    taps = [xp[:, i:i + H, j:j + W, :] for i in range(K) for j in range(K)]
    cols = jnp.stack(taps, axis=3).reshape(B, total, kkc)
    cols = jnp.pad(cols, ((0, 0), (0, 0), (0, lane_pad - kkc)))
    cols = cols.reshape(bt, tp, lane_pad).astype(jnp.bfloat16)

    # --- fused conv weight (K*K*C -> 128, hidden -> 128) bf16, bias f32 ----------
    w_c = jnp.transpose(w_conv, (2, 3, 1, 0)).reshape(kkc, hidden)
    w_c = jnp.pad(w_c, ((0, lane_pad - kkc), (0, lane_pad - hidden))).astype(jnp.bfloat16)
    b_c = jnp.pad(b_conv, (0, lane_pad - hidden)).reshape(1, lane_pad).astype(jnp.float32)

    # --- head: fold 1/(H*W) pool scale into the weight, pad to 128 lanes ---------
    w_h = jnp.pad(w_head * (1.0 / total),
                  ((0, lane_pad - hidden), (0, lane_pad - classes))).astype(jnp.float32)
    b_h = jnp.pad(b_head, (0, lane_pad - classes)).reshape(1, lane_pad).astype(jnp.float32)

    # VMEM budget derived from actual buffer sizes (double-buffered input + resident
    # weights + slack for f32 intermediates) — tiny, fits every generation easily.
    vmem_limit = int(2 * tp * lane_pad * 2            # 2x bf16 input tiles
                     + 2 * lane_pad * lane_pad * 2    # conv weight buffers
                     + (4 << 20))                     # headroom

    partials = pl.pallas_call(
        _conv_pool_kernel,
        out_shape=jax.ShapeDtypeStruct((bt, 1, lane_pad), jnp.float32),
        grid_spec=pltpu.PrefetchScalarGridSpec(
            num_scalar_prefetch=0,
            grid=(bt,),
            in_specs=[
                pl.BlockSpec((1, tp, lane_pad), lambda i: (i, 0, 0)),
                pl.BlockSpec((lane_pad, lane_pad), lambda i: (0, 0)),   # resident weight
                pl.BlockSpec((1, lane_pad), lambda i: (0, 0)),          # resident bias
            ],
            out_specs=pl.BlockSpec((1, 1, lane_pad), lambda i: (i, 0, 0)),
        ),
        compiler_params=pltpu.CompilerParams(
            dimension_semantics=("parallel",),
            vmem_limit_bytes=vmem_limit),
    )(cols, w_c, b_c)

    # Reduce per-tile partial pools (tiny XLA add), then classifier head in Pallas.
    pooled = partials.reshape(B, n_tiles, lane_pad).sum(axis=1)          # (B, 128) f32

    logits_pad = pl.pallas_call(
        _head_kernel,
        out_shape=jax.ShapeDtypeStruct((B, lane_pad), jnp.float32),
    )(pooled, w_h, b_h)

    return logits_pad[:, :classes]


# --------------------------- pure-JAX reference -------------------------------
def _reference_forward(x_nchw, w_conv, b_conv, w_head, b_head):
    B, C, H, W = x_nchw.shape
    K = w_conv.shape[-1]
    hidden = w_conv.shape[0]
    pad = K // 2
    hp = jax.lax.Precision.HIGHEST
    # Mimic the kernel's bf16 quantization of the streamed image and conv weight.
    x_nhwc = jnp.transpose(x_nchw, (0, 2, 3, 1)).astype(jnp.bfloat16).astype(jnp.float32)
    w_mat = jnp.transpose(w_conv, (2, 3, 1, 0)).reshape(K * K * C, hidden)
    w_mat = w_mat.astype(jnp.bfloat16).astype(jnp.float32)
    xp = jnp.pad(x_nhwc, ((0, 0), (pad, pad), (pad, pad), (0, 0)))
    cols = [xp[:, i:i + H, j:j + W, :] for i in range(K) for j in range(K)]
    patches = jnp.stack(cols, axis=3).reshape(B * H * W, K * K * C)
    feat = jnp.maximum(jnp.dot(patches, w_mat, precision=hp) + b_conv, 0.0)
    pooled = feat.reshape(B, H * W, hidden).mean(axis=1)
    return jnp.dot(pooled, w_head, precision=hp) + b_head


# --------------------------------- main ---------------------------------------
if __name__ == "__main__":
    B, C, H, W = 2, 4, 16, 16
    hidden, classes, K = 32, 10, 3

    key = jax.random.PRNGKey(0)
    kx, kw1, kb1, kw2, kb2, kl = jax.random.split(key, 6)

    x = jax.random.normal(kx, (B, C, H, W), dtype=jnp.float32)       # NCHW input
    labels = jax.random.randint(kl, (B,), 0, classes)                # unused (NoOpAttacker)

    w_conv = jax.random.normal(kw1, (hidden, C, K, K), dtype=jnp.float32) * 0.1
    b_conv = jax.random.normal(kb1, (hidden,), dtype=jnp.float32) * 0.1
    w_head = jax.random.normal(kw2, (hidden, classes), dtype=jnp.float32) * 0.1
    b_head = jax.random.normal(kb2, (classes,), dtype=jnp.float32) * 0.1

    logits = adv_model_forward(x, labels, w_conv, b_conv, w_head, b_head)
    logits = jax.block_until_ready(logits)

    ref = _reference_forward(x, w_conv, b_conv, w_head, b_head)
    assert logits.shape == (B, classes)
    assert jnp.allclose(logits, ref, atol=1e-3, rtol=1e-2), float(
        jnp.max(jnp.abs(logits - ref)))

    print("KERNEL_OK")
</pallas_src>

<mosaic_0001>
module attributes {stable_mosaic.version = 11 : i64} {
  func.func @_conv_pool_kernel(%arg0: i32, %arg1: memref<1x128x128xbf16, #tpu.memory_space<vmem>>, %arg2: memref<128x128xbf16, #tpu.memory_space<vmem>>, %arg3: memref<1x128xf32, #tpu.memory_space<vmem>>, %arg4: memref<1x1x128xf32, #tpu.memory_space<vmem>>) attributes {dimension_semantics = [#tpu.dimension_semantics<parallel>], iteration_bounds = array<i64: 4>, scalar_prefetch = 0 : i64, scratch_operands = 0 : i64, tpu.core_type = #tpu.core_type<tc>, window_params = [{transform_indices = @transform_0, window_bounds = array<i64: 1, 128, 128>}, {pipeline_mode = #tpu.pipeline_mode<synchronous>, transform_indices = @transform_1, window_bounds = array<i64: 128, 128>}, {pipeline_mode = #tpu.pipeline_mode<synchronous>, transform_indices = @transform_2, window_bounds = array<i64: 1, 128>}, {transform_indices = @transform_3, window_bounds = array<i64: 1, 1, 128>}]} {
    %c0 = arith.constant 0 : index
    %c0_0 = arith.constant 0 : index
    %c0_1 = arith.constant 0 : index
    %0 = vector.load %arg1[%c0, %c0_0, %c0_1] : memref<1x128x128xbf16, #tpu.memory_space<vmem>>, vector<1x128x128xbf16>
    %1 = vector.shape_cast %0 : vector<1x128x128xbf16> to vector<128x128xbf16>
    %c0_2 = arith.constant 0 : index
    %c0_3 = arith.constant 0 : index
    %2 = vector.load %arg2[%c0_2, %c0_3] : memref<128x128xbf16, #tpu.memory_space<vmem>>, vector<128x128xbf16>
    %cst = arith.constant dense<0.000000e+00> : vector<128x128xf32>
    %3 = tpu.matmul %1, %2, %cst {dimension_numbers = #tpu.dot_dimension_numbers<[1], [0], [0], [1], [0, 0, 1, 1], [], []>} : vector<128x128xbf16>, vector<128x128xbf16>, vector<128x128xf32> -> vector<128x128xf32>
    %c0_4 = arith.constant 0 : index
    %c0_5 = arith.constant 0 : index
    %4 = vector.load %arg3[%c0_4, %c0_5] : memref<1x128xf32, #tpu.memory_space<vmem>>, vector<1x128xf32>
    %5 = vector.broadcast %4 : vector<1x128xf32> to vector<128x128xf32>
    %6 = arith.addf %3, %5 : vector<128x128xf32>
    %cst_6 = arith.constant 0.000000e+00 : f32
    %7 = vector.broadcast %cst_6 : f32 to vector<128x128xf32>
    %8 = arith.maximumf %6, %7 : vector<128x128xf32>
    %cst_7 = arith.constant dense<0.000000e+00> : vector<128xf32>
    %9 = vector.multi_reduction <add>, %8, %cst_7 [0] : vector<128x128xf32> to vector<128xf32>
    %10 = vector.shape_cast %9 : vector<128xf32> to vector<1x128xf32>
    %c0_8 = arith.constant 0 : index
    %c0_9 = arith.constant 0 : index
    %c0_10 = arith.constant 0 : index
    %11 = vector.load %arg4[%c0_8, %c0_9, %c0_10] : memref<1x1x128xf32, #tpu.memory_space<vmem>>, vector<1x1x128xf32>
    %12 = vector.shape_cast %11 : vector<1x1x128xf32> to vector<1x128xf32>
    %13 = vector.shape_cast %10 : vector<1x128xf32> to vector<1x1x128xf32>
    tpu.vector_store %arg4[%c0_8, %c0_9, %c0_10], %13 {strides = array<i32>} : memref<1x1x128xf32, #tpu.memory_space<vmem>>, vector<1x1x128xf32>,
    return
  }
  func.func @transform_0(%arg0: i32) -> (i32, i32, i32) {
    %c0_i32 = arith.constant 0 : i32
    %c0_i32_0 = arith.constant 0 : i32
    %c0_i32_1 = arith.constant 0 : i32
    return %arg0, %c0_i32, %c0_i32_0 : i32, i32, i32
  }
  func.func @transform_1(%arg0: i32) -> (i32, i32) {
    %c0_i32 = arith.constant 0 : i32
    %c0_i32_0 = arith.constant 0 : i32
    %c0_i32_1 = arith.constant 0 : i32
    return %c0_i32, %c0_i32_0 : i32, i32
  }
  func.func @transform_2(%arg0: i32) -> (i32, i32) {
    %c0_i32 = arith.constant 0 : i32
    %c0_i32_0 = arith.constant 0 : i32
    %c0_i32_1 = arith.constant 0 : i32
    return %c0_i32, %c0_i32_0 : i32, i32
  }
  func.func @transform_3(%arg0: i32) -> (i32, i32, i32) {
    %c0_i32 = arith.constant 0 : i32
    %c0_i32_0 = arith.constant 0 : i32
    %c0_i32_1 = arith.constant 0 : i32
    return %arg0, %c0_i32, %c0_i32_0 : i32, i32, i32
  }
}

</mosaic_0001>

<bundles_post_ra>
// kernel: tpu_custom_call.1
= control target key start
LH: loop header
LB: loop body
LE: loop exit
PB: predicated region body
PF: predicated region fallthrough
CT: control target
= control target key end

     0   :  { %8 = vsyncpa [#allocation3], 0  ;;  %s1098_s0 = inlined_call_operand.hbm [shape: bf16[4,128,128], index: 0, kind: input, shape index: {}]   ;;  %s1099_s1 = inlined_call_operand.hbm [shape: bf16[128,128], index: 1, kind: input, shape index: {}]   ;;  %s1100_s2 = inlined_call_operand.vmem [shape: f32[1,128], index: 2, kind: input, shape index: {}]   ;;  %s1101_s3 = inlined_call_operand.hbm [shape: f32[4,1,128], index: 3, kind: output, shape index: {}]  }
   0x1   :  { %10 = vsyncpa [#allocation3 + $0x1], 0 }
   0x2   :  { %11 = vsyncpa [#allocation6], 0 }
   0x3   :  { %12 = vsyncpa [#allocation4], 0 }
   0x4   :  { %14 = vsyncpa [#allocation4 + $0x1], 0  ;;  %s888_s12 = smov 0   ;;  %s890_s13 = smov 0  }
   0x5   :  { %s892_s14 = smov 0   ;;  %s894_s15 = smov 0  }
   0x6 LB: > { %s909_s16 = sadd.s32 4294967295, %s861_s15   ;;  %s563_s17 = sadd.s32 4294967294, %s861_s15   ;;  %s861_s15 = sphi %s894_s15, %s1120_s15   ;;  %s857_s14 = sphi %s892_s14, %s1119_s14   ;;  %s853_s13 = sphi %s890_s13, %s1118_s13   ;;  %s849_s12 = sphi %s888_s12, %s1117_s12  }
   0x7   : > { %p40_p0 = scmp.ne.s32.totalorder %s853_s13, %s849_s12  ;;  %p1102_p1 = scmp.eq.s32.totalorder %s909_s16, 0 }
   0x8   : > { %p112_p3 = scmp.eq.s32.totalorder %s563_s17, 3  ;;  %p564_p5 = scmp.ge.s32.totalorder %s861_s15, 1 }
   0x9   : > { %p918_p4 = por %p1102_p1, %p40_p0  ;;  %p119_p7 = scmp.lt.s32.totalorder %s861_s15, 5 }
   0xa   : > { %p923_p6 = por %p112_p3, %p40_p0  ;;  %s863_s21 = smov [#allocation5]  }
   0xb   : > { %s1105_s18 = scalar_select %p918_p4, 1, 0 }
   0xc   : > { %s1106_s19 = scalar_select %p923_p6, 1, 0 }
   0xd   : > { %p928_p8 = pnand %p564_p5, %p119_p7  ;;  %s131_s22 = sshll.u32 %s863_s21, 4  ;;  %s132_s22 = int_to_ptr.vmem [resolvable:$true] %s131_s22 }
   0xe   : > { %s941_s24 = sadd.s32 1, %s861_s15   ;;  %s27_s25 = sadd.s32 1, %s857_s14 }
   0xf   : > { %s1107_s20 = scalar_select %p928_p8, 1, 0 }
  0x10   : > { %p666_p9 = pneg %p928_p8  ;;  %s24_s26 = ssub.s32 %s861_s15, %s941_s24 }
  0x11   : > { %s733_s29 = scalar_lea.hbm %s1099_s1, 1024 }
  0x12   : > { %p936_p10 = pnand %p666_p9, %p1102_p1  ;;  %p734_p11 = scmp.ne.s32.totalorder %s1099_s1, %s733_s29 }
  0x13   : > { %p740_p3 = scmp.lt.u32.totalorder %s733_s29, %s1099_s1 }
  0x14   : > { %p735_p12 = pneg %p936_p10 }
  0x16   : > { %p736_p13 = pnand %p735_p12, %p734_p11 }
  0x18   : > { %p737_p0 = pneg %p736_p13 }
  0x1a   : > { %p742_p5 = pnand %p740_p3, %p737_p0 }
  0x1c   : > { %745 = shalt.err (!%p742_p5)
}
  0x1d   : > { %s746_s7 = scalar_lea.vmem %s132_s22, 1024  ;;  %p754_p2 = scmp.lt.s32.totalorder %s132_s22, %s132_s22 }
  0x1e   : > { %p747_p7 = scmp.ne.s32.totalorder %s132_s22, %s746_s7  ;;  %p755_p6 = scmp.lt.s32.totalorder %s746_s7, %s746_s7 }
  0x20   : > { %p749_p9 = pnand %p747_p7, %p735_p12  ;;  %p756_p4 = por %p755_p6, %p754_p2 }
  0x22   : > { %p750_p1 = pneg %p749_p9 }
  0x24   : > { %p757_p8 = pnand %p756_p4, %p750_p1 }
  0x26   : > { %760 = shalt.err (!%p757_p8)
}
  0x27   : > { %s864_s8 = smov 64   ;;  %s865_s9 = smov 4  }
  0x28   : > { %669 = dma.hbm_to_vmem [thread:$0]  (!%p936_p10), %s1099_s1, 1024, %s132_s22, [#allocation6], %s864_s8, %s864_s8, %s865_s9  }
  0x29   : > { %p25_p1 = scmp.eq.s32.totalorder %s24_s26, 0  ;;  %p34_p2 = scmp.ne.s32.totalorder %s857_s14, %s853_s13 }
  0x2a   : > { %p35_p4 = scmp.eq.s32.totalorder %s861_s15, 0  ;;  %p679_p6 = scmp.lt.s32.totalorder %s861_s15, 4 }
  0x2b   : > { %s970_s17 = scalar_select %p25_p1, %s857_s14, %s27_s25  }
  0x2c   : > { %p36_p8 = por %p35_p4, %p34_p2  ;;  %p1109_p11 = scmp.eq.s32.totalorder %s909_s16, 3 }
  0x2d   : > { %s148_s23 = sand.u32 1, %s857_s14   ;;  %s593_s27 = sshll.u32 %s861_s15, 10 }
  0x2e   : > { %p974_p12 = por %p1109_p11, %p34_p2  ;;  %s567_s28 = sshll.u32 %s148_s23, 6 }
  0x2f   : > { %s983_s4 = scalar_lea.hbm %s1098_s0, %s593_s27  ;;  %s152_s22 = scalar_lea.vmem [#allocation2], %s567_s28 }
  0x30   : > { %s159_s25 = sshll.u32 %s152_s22, 4  ;;  %p985_p10 = pnand %p679_p6, %p36_p8  ;;  %s989_s25 = int_to_ptr.vmem [resolvable:$true] %s159_s25 }
  0x31   : > { %s991_s5 = scalar_lea.sflag [#allocation3], %s148_s23  ;;  %s761_s6 = scalar_lea.hbm %s983_s4, 1024 }
  0x32   : > { %p762_p13 = scmp.ne.s32.totalorder %s983_s4, %s761_s6  ;;  %p763_p0 = pneg %p985_p10 }
  0x33   : > { %s766_s11 = scalar_lea.hbm %s1098_s0, 4096  ;;  %p767_p7 = scmp.lt.u32.totalorder %s983_s4, %s1098_s0 }
  0x34   : > { %p764_p3 = pnand %p763_p0, %p762_p13  ;;  %p768_p9 = scmp.lt.u32.totalorder %s766_s11, %s761_s6 }
  0x35   : > { %p770_p2 = scmp.lt.u32.totalorder %s761_s6, %s983_s4 }
  0x36   : > { %p765_p5 = pneg %p764_p3  ;;  %p769_p1 = por %p768_p9, %p767_p7 }
  0x38   : > { %p771_p4 = por %p770_p2, %p769_p1 }
  0x3a   : > { %p772_p6 = pnand %p771_p4, %p765_p5 }
  0x3c   : > { %775 = shalt.err (!%p772_p6)
}
  0x3d   : > { %s776_s23 = scalar_lea.vmem %s989_s25, 1024  ;;  %s866_s29 = smov [#allocation2]  }
  0x3e   : > { %p777_p8 = scmp.ne.s32.totalorder %s989_s25, %s776_s23  ;;  %s781_s30 = sshll.u32 %s866_s29, 4  ;;  %s782_s30 = int_to_ptr.vmem [resolvable:$false] %s781_s30 }
  0x3f   : > { %s783_s22 = scalar_lea.vmem %s782_s30, 2048  ;;  %p784_p3 = scmp.lt.s32.totalorder %s989_s25, %s782_s30 }
  0x40   : > { %p779_p11 = pnand %p777_p8, %p763_p0  ;;  %p785_p7 = scmp.lt.s32.totalorder %s783_s22, %s776_s23 }
  0x42   : > { %p780_p13 = pneg %p779_p11  ;;  %p786_p9 = por %p785_p7, %p784_p3 }
  0x44   : > { %p787_p1 = pnand %p786_p9, %p780_p13 }
  0x46   : > { %790 = shalt.err (!%p787_p1)
}
  0x47   : > { %673 = dma.hbm_to_vmem [thread:$0]  (!%p985_p10), %s983_s4, 1024, %s989_s25, %s991_s5, %s864_s8, %s864_s8, %s865_s9  }
  0x48   : > { %p1112_p0 = scmp.ne.s32.totalorder %s1107_s20, 0 }
  0x49   : > { %s1025_s6 = sand.u32 (!%p1112_p0), 1, %s853_s13   ;;  %p1113_p5 = scmp.ne.s32.totalorder (!%p1112_p0), %s1105_s18, 0 }
  0x4a   : > { %171 = sbr.rel (%p1112_p0) target bundleno = 393 (0x189), region = 32  ;;  %s571_s7 = sshll.u32 (!%p1112_p0), %s1025_s6, 6 }
  0x4b   : > { %s174_s10 = scalar_lea.sflag (!%p1112_p0), [#allocation3], %s1025_s6  ;;  %s1029_s11 = scalar_lea.vmem (!%p1112_p0), [#allocation2], %s571_s7 }
  0x51   : > { %836 = dma.done.wait (%p1113_p5), %s174_s10, 1024  }
  0x52   : > { %838 = vsyncadd (%p1113_p5), %s174_s10, 4294966272  ;;  %p1114_p10 = scmp.eq.s32.totalorder %s909_s16, 0 }
  0x54   : > { %840 = dma.done.wait (%p1114_p10), [#allocation6], 1024   ;;  %p1115_p2 = pmov %p1114_p10 }
  0x55   : > { %v717_v0 = vld [vmem:[#allocation5] sm:$0xff]   ;;  %v718_v1 = vld [vmem:[#allocation5 + $0x8] sm:$0xff]   ;;  %v719_v2 = vld [vmem:[#allocation5 + $0x10] sm:$0xff]   ;;  %s590_s8 = sshll.u32 %s909_s16, 4  ;;  %s202_s9 = scalar_lea.vmem [#allocation7], %s1025_s6 }
  0x56   : > { %842 = vsyncadd (%p1115_p2), [#allocation6], 4294966272  ;;  %610 = vmatprep.subr.bf16.mxu0 %v717_v0  ;;  %642 = vmatprep.subr.bf16.mxu1 %v717_v0  ;;  %v720_v3 = vld [vmem:[#allocation5 + $0x18] sm:$0xff]   ;;  %v725_v4 = vld [vmem:[%s1029_s11] sm:$0xff]   ;;  %s487_s4 = sshll.u32 %s202_s9, 4  ;;  %s1055_s5 = scalar_lea.hbm %s1101_s3, %s590_s8  ;;  %s1057_s4 = int_to_ptr.vmem [resolvable:$true] %s487_s4 }
  0x57   : > { %611 = vmatpush3.bf16.msra.mxu0 %v717_v0  ;;  %650 = vmatpush3.bf16.msra.mxu1 %v717_v0  ;;  %v721_v5 = vld [vmem:[#allocation5 + $0x20] sm:$0xff]   ;;  %v722_v7 = vld [vmem:[#allocation5 + $0x28] sm:$0xff]   ;;  %v723_v8 = vld [vmem:[#allocation5 + $0x30] sm:$0xff]   ;;  %s475_s27 = scalar_lea.sflag [#allocation4], %s1025_s6  ;;  %s791_s28 = scalar_lea.vmem %s1057_s4, 16 }
  0x58   : > { %612 = vmatprep.subr.bf16.mxu0 %v718_v1  ;;  %643 = vmatprep.subr.bf16.mxu1 %v718_v1  ;;  %v729_v6 = vld [vmem:[%s1029_s11 + $0x20] sm:$0xff]   ;;  %v724_v9 = vld [vmem:[#allocation5 + $0x38] sm:$0xff]   ;;  %v726_v10 = vld [vmem:[%s1029_s11 + $0x8] sm:$0xff]   ;;  %p792_p4 = scmp.ne.s32.totalorder %s1057_s4, %s791_s28  ;;  %s867_s16 = smov [#allocation7]  }
  0x59   : > { %626 = vmatprep.mubr.bf16.mxu0 %v725_v4  ;;  %634 = vmatprep.mubr.bf16.mxu1 %v729_v6  ;;  %v730_v11 = vld [vmem:[%s1029_s11 + $0x28] sm:$0xff]   ;;  %v727_v12 = vld [vmem:[%s1029_s11 + $0x10] sm:$0xff]   ;;  %v728_v14 = vld [vmem:[%s1029_s11 + $0x18] sm:$0xff]   ;;  %s795_s23 = sshll.u32 %s867_s16, 4  ;;  %s796_s23 = int_to_ptr.vmem [resolvable:$false] %s795_s23 }
  0x5a   : > { %v731_v13 = vld [vmem:[%s1029_s11 + $0x30] sm:$0xff]   ;;  %v732_v15 = vld [vmem:[%s1029_s11 + $0x38] sm:$0xff]   ;;  %v573_v16 = vld [vmem:[%s1100_s2] ss:$0 sm:$0xff]  ;;  %p793_p6 = pnand %p792_p4, %p974_p12  ;;  %s797_s29 = scalar_lea.vmem %s796_s23, 32 }
  0x5b   : > { %613 = vmatpush3.bf16.msra.mxu0 %v718_v1  ;;  %651 = vmatpush3.bf16.msra.mxu1 %v718_v1  ;;  %p798_p11 = scmp.lt.s32.totalorder %s1057_s4, %s796_s23  ;;  %p799_p13 = scmp.lt.s32.totalorder %s797_s29, %s791_s28 }
  0x5c   : > { %614 = vmatprep.subr.bf16.mxu0 %v719_v2  ;;  %644 = vmatprep.subr.bf16.mxu1 %v719_v2  ;;  %p794_p8 = pneg %p793_p6 }
  0x5d   : > { %p800_p3 = por %p799_p13, %p798_p11 }
  0x5f   : > { %615 = vmatpush3.bf16.msra.mxu0 %v719_v2  ;;  %652 = vmatpush3.bf16.msra.mxu1 %v719_v2  ;;  %p801_p7 = pnand %p800_p3, %p794_p8 }
  0x60   : > { %616 = vmatprep.subr.bf16.mxu0 %v720_v3  ;;  %645 = vmatprep.subr.bf16.mxu1 %v720_v3 }
  0x63   : > { %617 = vmatpush3.bf16.msra.mxu0 %v720_v3  ;;  %653 = vmatpush3.bf16.msra.mxu1 %v720_v3 }
  0x64   : > { %618 = vmatprep.subr.bf16.mxu0 %v721_v5  ;;  %646 = vmatprep.subr.bf16.mxu1 %v721_v5 }
  0x67   : > { %619 = vmatpush3.bf16.msra.mxu0 %v721_v5  ;;  %654 = vmatpush3.bf16.msra.mxu1 %v721_v5 }
  0x68   : > { %620 = vmatprep.subr.bf16.mxu0 %v722_v7  ;;  %647 = vmatprep.subr.bf16.mxu1 %v722_v7 }
  0x6b   : > { %621 = vmatpush3.bf16.msra.mxu0 %v722_v7  ;;  %655 = vmatpush3.bf16.msra.mxu1 %v722_v7 }
  0x6c   : > { %622 = vmatprep.subr.bf16.mxu0 %v723_v8  ;;  %648 = vmatprep.subr.bf16.mxu1 %v723_v8 }
  0x6f   : > { %623 = vmatpush3.bf16.msra.mxu0 %v723_v8  ;;  %656 = vmatpush3.bf16.msra.mxu1 %v723_v8 }
  0x70   : > { %624 = vmatprep.subr.bf16.mxu0 %v724_v9  ;;  %649 = vmatprep.subr.bf16.mxu1 %v724_v9 }
  0x73   : > { %625 = vmatpush3.bf16.msra.mxu0 %v724_v9  ;;  %657 = vmatpush3.bf16.msra.mxu1 %v724_v9 }
  0x76   : > { %627 = vmatmul.mubr.bf16.vlgmr.msra.gmra.mrb[0].mxu0 %v726_v10  ;;  %635 = vmatmul.mubr.bf16.vlgmr.msra.gmra.mrb[0].mxu1 %v730_v11 }
  0x77   : > { %630 = vmatprep.mubr.bf16.mxu0 %v727_v12  ;;  %638 = vmatprep.mubr.bf16.mxu1 %v731_v13 }
  0x7e   : > { %631 = vmatmul.mubr.bf16.gmra.mrb[4].mxu0 %v728_v14  ;;  %639 = vmatmul.mubr.bf16.gmra.mrb[4].mxu1 %v732_v15 }
 0x149   : > { %v628_v17 = vpop.f32.mrb[0].mxu0  ;;  %v636_v18 = vpop.f32.mrb[0].mxu1 }
 0x14a   : > { %v373_v19 = vpop.f32.mrb[1].mxu0  ;;  %v405_v20 = vpop.f32.mrb[1].mxu1  ;;  %v382_v26 = vadd.f32 %v628_v17, %v573_v16  ;;  %v414_v58 = vadd.f32 %v636_v18, %v573_v16 }
 0x14b   : > { %v374_v21 = vadd.f32 %v573_v16, %v373_v19  ;;  %v629_v22 = vpop.f32.mrb[2].mxu0  ;;  %v637_v23 = vpop.f32.mrb[2].mxu1  ;;  %v406_v51 = vadd.f32 %v573_v16, %v405_v20 }
 0x14c   : > { %v376_v24 = vpop.f32.mrb[3].mxu0  ;;  %v408_v25 = vpop.f32.mrb[3].mxu1  ;;  %v385_v29 = vadd.f32 %v629_v22, %v573_v16  ;;  %v438_v31 = vmax.f32 %v382_v26, 0.0  ;;  %v417_v61 = vadd.f32 %v637_v23, %v573_v16  ;;  %v446_v0 = vmax.f32 %v414_v58, 0.0 }
 0x14d   : > { %v377_v27 = vadd.f32 %v573_v16, %v376_v24  ;;  %v436_v28 = vmax.f32 %v374_v21, 0.0  ;;  %v444_v56 = vmax.f32 %v406_v51, 0.0  ;;  %v409_v57 = vadd.f32 %v573_v16, %v408_v25 }
 0x14e   : > { %v439_v37 = vmax.f32 %v385_v29, 0.0  ;;  %v447_v2 = vmax.f32 %v417_v61, 0.0 }
 0x14f   : > { %v437_v30 = vmax.f32 %v377_v27, 0.0  ;;  %v445_v62 = vmax.f32 %v409_v57, 0.0 }
 0x151   : > { %v452_v32 = vadd.f32 %v437_v30, %v436_v28  ;;  %v632_v33 = vpop.f32.mrb[4].mxu0  ;;  %v640_v34 = vpop.f32.mrb[4].mxu1 }
 0x152   : > { %v389_v35 = vpop.f32.mrb[5].mxu0  ;;  %v421_v36 = vpop.f32.mrb[5].mxu1  ;;  %v398_v44 = vadd.f32 %v632_v33, %v573_v16  ;;  %v430_v6 = vadd.f32 %v640_v34, %v573_v16 }
 0x153   : > { %v453_v38 = vadd.f32 %v452_v32, %v438_v31  ;;  %v390_v39 = vadd.f32 %v573_v16, %v389_v35  ;;  %v633_v40 = vpop.f32.mrb[6].mxu0  ;;  %v641_v41 = vpop.f32.mrb[6].mxu1  ;;  %v422_v63 = vadd.f32 %v573_v16, %v421_v36 }
 0x154   : > { %v392_v42 = vpop.f32.mrb[7].mxu0  ;;  %v424_v43 = vpop.f32.mrb[7].mxu1  ;;  %v401_v49 = vadd.f32 %v633_v40, %v573_v16  ;;  %v442_v52 = vmax.f32 %v398_v44, 0.0  ;;  %v433_v9 = vadd.f32 %v641_v41, %v573_v16  ;;  %v450_v11 = vmax.f32 %v430_v6, 0.0 }
 0x155   : > { %v440_v45 = vmax.f32 %v390_v39, 0.0  ;;  %v454_v46 = vadd.f32 %v453_v38, %v439_v37  ;;  %v393_v47 = vadd.f32 %v573_v16, %v392_v42  ;;  %v448_v4 = vmax.f32 %v422_v63, 0.0 }
 0x156   : > { %v443_v54 = vmax.f32 %v401_v49, 0.0  ;;  %v425_v5 = vadd.f32 %v573_v16, %v424_v43  ;;  %v451_v13 = vmax.f32 %v433_v9, 0.0 }
 0x157   : > { %v455_v48 = vadd.f32 %v454_v46, %v440_v45  ;;  %v441_v50 = vmax.f32 %v393_v47, 0.0 }
 0x158   : > { %v449_v10 = vmax.f32 %v425_v5, 0.0 }
 0x159   : > { %v456_v53 = vadd.f32 %v455_v48, %v441_v50 }
 0x15b   : > { %v457_v55 = vadd.f32 %v456_v53, %v442_v52 }
 0x15d   : > { %v458_v59 = vadd.f32 %v457_v55, %v443_v54 }
 0x15f   : > { %v459_v60 = vadd.f32 %v458_v59, %v444_v56 }
 0x161   : > { %v460_v1 = vadd.f32 %v459_v60, %v445_v62 }
 0x163   : > { %v461_v3 = vadd.f32 %v460_v1, %v446_v0 }
 0x165   : > { %v462_v7 = vadd.f32 %v461_v3, %v447_v2 }
 0x167   : > { %v463_v8 = vadd.f32 %v462_v7, %v448_v4 }
 0x169   : > { %v464_v12 = vadd.f32 %v463_v8, %v449_v10 }
 0x16b   : > { %v465_v14 = vadd.f32 %v464_v12, %v450_v11 }
 0x16d   : > { %v466_v15 = vadd.f32 %v465_v14, %v451_v13 }
 0x16f   : > { %v467_v17 = vrot.slane %v466_v15, 4 }
 0x171   : > { %v468_v18 = vadd.f32 %v467_v17, %v466_v15 }
 0x173   : > { %v469_v19 = vrot.slane %v468_v18, 2 }
 0x175   : > { %v470_v20 = vadd.f32 %v469_v19, %v468_v18 }
 0x177   : > { %v471_v21 = vrot.slane %v470_v20, 1 }
 0x179   : > { %v472_v22 = vadd.f32 %v471_v21, %v470_v20 }
 0x17b   : > { %473 = vst [vmem:[%s202_s9] sm:$0x1] %v472_v22 }
 0x17c   : > { %804 = shalt.err (!%p801_p7)
}
 0x17d   : > { %s805_s30 = scalar_lea.hbm %s1055_s5, 16  ;;  %s809_s7 = scalar_lea.hbm %s1101_s3, 64 }
 0x17e   : > { %p806_p9 = scmp.ne.s32.totalorder %s1055_s5, %s805_s30  ;;  %p810_p5 = scmp.lt.u32.totalorder %s1055_s5, %s1101_s3 }
 0x17f   : > { %p811_p10 = scmp.lt.u32.totalorder %s809_s7, %s805_s30  ;;  %p813_p4 = scmp.lt.u32.totalorder %s805_s30, %s1055_s5 }
 0x180   : > { %p807_p1 = pnand %p806_p9, %p974_p12 }
 0x181   : > { %p812_p2 = por %p811_p10, %p810_p5 }
 0x182   : > { %p808_p0 = pneg %p807_p1 }
 0x183   : > { %p814_p6 = por %p813_p4, %p812_p2 }
 0x185   : > { %p815_p8 = pnand %p814_p6, %p808_p0 }
 0x187   : > { %818 = shalt.err (!%p815_p8)
}
 0x188   : > { %664 = dma.vmem_to_hbm [thread:$0]  (%p974_p12), %s1057_s4, 16, %s1055_s5, %s475_s27  }
 0x189 PF: > { %p681_p11 = scmp.ge.s32.totalorder %s861_s15, 2  ;;  %s499_s18 = sand.u32 1, %s849_s12  }
 0x18a   : > { %p1116_p13 = scmp.ne.s32.totalorder %s1106_s19, 0  ;;  %s500_s20 = scalar_lea.sflag [#allocation4], %s499_s18 }
 0x18c   : > { %p675_p3 = pnand %p681_p11, %p1116_p13 }
 0x18e   : > { %844 = dma.done.wait (!%p675_p3), %s500_s20, 16  }
 0x18f   : > { %846 = vsyncadd (!%p675_p3), %s500_s20, 4294967280  ;;  %p17_p7 = scmp.ge.s32.totalorder %s941_s24, 6   ;;  %s1117_s12 = smov %s853_s13 }
 0x190   : > { %s1118_s13 = smov %s857_s14  ;;  %s1119_s14 = smov %s970_s17 }
 0x191   : > { %s1120_s15 = smov %s941_s24  ;;  %19 = sbr.rel (!%p17_p7) target bundleno = 6 (0x6), region = 81 }
 0x198   :  { %504 = vsyncpa [#allocation3], 1 }
 0x199   :  { %506 = vsyncpa [#allocation3 + $0x1], 1 }
 0x19a   :  { %507 = vsyncpa [#allocation6], 1 }
 0x19b   :  { %508 = vsyncpa [#allocation4], 1 }
 0x19c   :  { %510 = vsyncpa [#allocation4 + $0x1], 1 }

</bundles_post_ra>
